<compile_context>
chip_gen: v5e
topology: v5e:2x2
jax: 0.10.0
libtpu: 0.0.40
codegen_flags: <defaults>
</compile_context>

<pallas_src>
import functools
import math

import jax
import jax.numpy as jnp
from jax.experimental import pallas as pl
from jax.experimental.pallas import tpu as pltpu

LANE = 128


def _round_up(v, m):
    return ((v + m - 1) // m) * m


def _pad2d(x, rows, cols):
    r, c = x.shape
    return jnp.pad(x, ((0, rows - r), (0, cols - c)))


# ------------------------------- kernels -------------------------------------

def _linear_kernel(x_ref, w_ref, o_ref):
    # (tm, Cin_pad) @ (Cin_pad, Cout_pad): bf16 operands -> single MXU pass,
    # f32 accumulate, bf16 store.
    o_ref[...] = jnp.dot(
        x_ref[...].astype(jnp.bfloat16), w_ref[...],
        preferred_element_type=jnp.float32).astype(o_ref.dtype)


def _prop_fused_kernel(a_ref, p_ref, b1_ref, w2_ref, o_ref, acc_ref, *, tk):
    # Layer-1 aggregation + fused layer-2 feature transform:
    #   acc[i] = sum_k A[i,k] @ P1[k]                      (f32 accumulate)
    #   o[i]   = (tanh(acc[i] + b1) @ W2) -> P2 (bf16)     (no H1 HBM roundtrip)
    # P1 and W2 are VMEM-resident; only the (tm, tk) A tile streams from HBM.
    k = pl.program_id(1)

    @pl.when(k == 0)
    def _():
        acc_ref[...] = jnp.zeros_like(acc_ref)

    ks = pl.multiple_of(k * tk, tk)
    acc_ref[...] += jnp.dot(a_ref[...], p_ref[pl.ds(ks, tk), :],
                            preferred_element_type=jnp.float32)

    @pl.when(k == pl.num_programs(1) - 1)
    def _():
        h = jnp.tanh(acc_ref[...] + b1_ref[...])               # f32 epilogue
        o_ref[...] = jnp.dot(h.astype(jnp.bfloat16), w2_ref[...],
                             preferred_element_type=jnp.float32
                             ).astype(o_ref.dtype)


def _prop_out_kernel(a_ref, p_ref, b2_ref, o_ref, *, tk):
    # Layer-2 aggregation, accumulating directly into the revisited f32 output
    # block: o[i] = b2 + sum_k A[i,k] @ P2[k].  P2 is VMEM-resident.
    k = pl.program_id(1)

    @pl.when(k == 0)
    def _():
        o_ref[...] = jnp.broadcast_to(b2_ref[...], o_ref.shape)

    ks = pl.multiple_of(k * tk, tk)
    o_ref[...] += jnp.dot(a_ref[...], p_ref[pl.ds(ks, tk), :],
                          preferred_element_type=jnp.float32)


# ------------------------------ wrappers --------------------------------------

def _vmem_limit(tm, tk, n_pad, cpad):
    # A double-buffered + resident P slab (+ W2 / bias / out / acc) + headroom.
    need = (2 * tm * tk * 2            # A tiles (bf16, double buffered)
            + 2 * n_pad * cpad * 2     # resident P slab (bf16)
            + 2 * cpad * cpad * 2      # resident W2 (bf16)
            + 2 * 8 * cpad * 4         # bias (sublane-padded)
            + 2 * tm * cpad * 4        # output block (f32 worst case)
            + tm * cpad * 4)           # f32 accumulator scratch
    return int(min(max(need * 3 // 2 + (2 << 20), 32 << 20), 100 << 20))


def _linear(x_p, w_p, tm):
    n_pad, cin_p = x_p.shape
    cout_p = w_p.shape[1]
    return pl.pallas_call(
        _linear_kernel,
        out_shape=jax.ShapeDtypeStruct((n_pad, cout_p), jnp.bfloat16),
        grid=(n_pad // tm,),
        in_specs=[
            pl.BlockSpec((tm, cin_p), lambda i: (i, 0)),
            pl.BlockSpec((cin_p, cout_p), lambda i: (0, 0)),
        ],
        out_specs=pl.BlockSpec((tm, cout_p), lambda i: (i, 0)),
        compiler_params=pltpu.CompilerParams(
            dimension_semantics=("parallel",)),
    )(x_p, w_p)


def _propagate_fused(a_p, p1, b1_p, w2_p, tm, tk):
    n_pad = a_p.shape[0]
    hid_p = p1.shape[1]
    out_p = w2_p.shape[1]
    kernel = functools.partial(_prop_fused_kernel, tk=tk)
    return pl.pallas_call(
        kernel,
        out_shape=jax.ShapeDtypeStruct((n_pad, out_p), jnp.bfloat16),
        grid=(n_pad // tm, n_pad // tk),
        in_specs=[
            pl.BlockSpec((tm, tk), lambda i, k: (i, k)),         # A tile (bf16)
            pl.BlockSpec((n_pad, hid_p), lambda i, k: (0, 0)),   # P1, resident
            pl.BlockSpec((1, hid_p), lambda i, k: (0, 0)),       # b1 (f32)
            pl.BlockSpec((hid_p, out_p), lambda i, k: (0, 0)),   # W2, resident
        ],
        out_specs=pl.BlockSpec((tm, out_p), lambda i, k: (i, 0)),
        scratch_shapes=[pltpu.VMEM((tm, hid_p), jnp.float32)],
        compiler_params=pltpu.CompilerParams(
            dimension_semantics=("parallel", "arbitrary"),
            vmem_limit_bytes=_vmem_limit(tm, tk, n_pad, hid_p)),
    )(a_p, p1, b1_p, w2_p)


def _propagate_out(a_p, p2, b2_p, tm, tk):
    n_pad = a_p.shape[0]
    out_p = p2.shape[1]
    kernel = functools.partial(_prop_out_kernel, tk=tk)
    return pl.pallas_call(
        kernel,
        out_shape=jax.ShapeDtypeStruct((n_pad, out_p), jnp.float32),
        grid=(n_pad // tm, n_pad // tk),
        in_specs=[
            pl.BlockSpec((tm, tk), lambda i, k: (i, k)),         # A tile (bf16)
            pl.BlockSpec((n_pad, out_p), lambda i, k: (0, 0)),   # P2, resident
            pl.BlockSpec((1, out_p), lambda i, k: (0, 0)),       # b2 (f32)
        ],
        out_specs=pl.BlockSpec((tm, out_p), lambda i, k: (i, 0)),
        compiler_params=pltpu.CompilerParams(
            dimension_semantics=("parallel", "arbitrary"),
            vmem_limit_bytes=_vmem_limit(tm, tk, n_pad, out_p)),
    )(a_p, p2, b2_p)


def _choose_tiles(n, tm, tk):
    """Clamp/snap tile sizes: >=2 row blocks where possible (v7x megacore),
    n padded only to a multiple of tm, tk snapped to a divisor of n_pad."""
    n_min = _round_up(n, LANE)
    tm = min(tm, n_min)
    if n_min >= 2 * LANE:
        tm = min(tm, max(LANE, (n_min // 2) // LANE * LANE))
    tm = max(LANE, (tm // LANE) * LANE)
    n_pad = _round_up(n, tm)
    tk = max(LANE, min(tk, n_pad))
    tk = math.gcd((tk // LANE) * LANE, n_pad)   # divisor of n_pad, mult of 128
    return tm, tk, n_pad


def make_gcn_encoder(a_norm, w1, b1, w2, b2, *, tm=512, tk=2048):
    """Build a forward(x) for GCNEncoder.

    All padding and the A bf16 repack happen ONCE here (GCNConv cached=True
    semantics); the per-call path is: tiny feature transform, then two
    A-streaming propagate kernels with resident feature slabs.
    """
    n = a_norm.shape[0]
    cin, hidden = w1.shape
    out_c = w2.shape[1]

    tm, tk, n_pad = _choose_tiles(n, tm, tk)

    cin_p = _round_up(cin, LANE)
    hid_p = _round_up(hidden, LANE)
    out_p = _round_up(out_c, LANE)

    # ---- one-time packing (hoisted out of the forward path) ----
    a_p = _pad2d(a_norm, n_pad, n_pad).astype(jnp.bfloat16)
    w1_p = _pad2d(w1, cin_p, hid_p).astype(jnp.bfloat16)
    b1_p = _pad2d(b1.reshape(1, -1), 1, hid_p).astype(jnp.float32)
    w2_p = _pad2d(w2, hid_p, out_p).astype(jnp.bfloat16)
    b2_p = _pad2d(b2.reshape(1, -1), 1, out_p).astype(jnp.float32)

    def forward(x):
        x_p = _pad2d(x, n_pad, cin_p)
        p1 = _linear(x_p, w1_p, tm)                         # X @ W1
        p2 = _propagate_fused(a_p, p1, b1_p, w2_p, tm, tk)  # tanh(A@P1+b1)@W2
        y = _propagate_out(a_p, p2, b2_p, tm, tk)           # A @ P2 + b2
        return y[:n, :out_c]

    return forward


# ------------------------------ glue (plain JAX) ------------------------------

def build_norm_adj(edge_index, num_nodes):
    """Dense symmetric-normalized adjacency with self-loops (glue, not kernel)."""
    src, dst = edge_index[0], edge_index[1]
    a = jnp.zeros((num_nodes, num_nodes), jnp.float32)
    a = a.at[dst, src].set(1.0)               # aggregate at destination node
    a_hat = a + jnp.eye(num_nodes, dtype=jnp.float32)
    deg = a_hat.sum(axis=1)
    dinv = jnp.where(deg > 0, jax.lax.rsqrt(deg), 0.0)
    return dinv[:, None] * a_hat * dinv[None, :]


def glorot(key, shape):
    fan_in, fan_out = shape
    limit = jnp.sqrt(6.0 / (fan_in + fan_out))
    return jax.random.uniform(key, shape, jnp.float32, -limit, limit)


if __name__ == "__main__":
    key = jax.random.PRNGKey(0)
    k_x, k_e, k_w1, k_w2 = jax.random.split(key, 4)

    num_nodes = 256
    in_channels = 8
    out_channels = 4
    hidden = 2 * out_channels          # GCNEncoder: conv1 -> 2*out, conv2 -> out
    num_edges = 1024

    x = jax.random.normal(k_x, (num_nodes, in_channels), jnp.float32)

    # random directed edges (2, E), no self-loops
    src = jax.random.randint(k_e, (num_edges,), 0, num_nodes)
    dst = (src + 1 + jax.random.randint(jax.random.fold_in(k_e, 1),
                                        (num_edges,), 0, num_nodes - 1)) % num_nodes
    edge_index = jnp.stack([src, dst]).astype(jnp.int32)

    # glorot weights, zero biases — matches GCNConv init
    w1 = glorot(k_w1, (in_channels, hidden))
    b1 = jnp.zeros((1, hidden), jnp.float32)
    w2 = glorot(k_w2, (hidden, out_channels))
    b2 = jnp.zeros((1, out_channels), jnp.float32)

    a_norm = build_norm_adj(edge_index, num_nodes)

    # tm=tk=128 exercises a real (2, 2) grid at this demo size.
    forward = make_gcn_encoder(a_norm, w1, b1, w2, b2, tm=128, tk=128)
    out = jax.block_until_ready(forward(x))
    assert out.shape == (num_nodes, out_channels)

    # f32 reference (high-precision matmuls). The kernel streams A and the
    # feature slabs in bf16 with f32 accumulation, so allow a small
    # quantization tolerance.
    hp = jax.lax.Precision.HIGHEST
    ref = jnp.tanh(jnp.dot(a_norm, jnp.dot(x, w1, precision=hp), precision=hp) + b1)
    ref = jnp.dot(a_norm, jnp.dot(ref, w2, precision=hp), precision=hp) + b2
    err = jnp.max(jnp.abs(out - ref))
    assert jnp.allclose(out, ref, atol=1e-1), (
        f"mismatch vs f32 reference: max|err|={err:.5f}")

    print("KERNEL_OK")
</pallas_src>

<mosaic_0001>
module attributes {stable_mosaic.version = 11 : i64} {
  func.func @_linear_kernel(%arg0: i32, %arg1: memref<128x128xf32, #tpu.memory_space<vmem>>, %arg2: memref<128x128xbf16, #tpu.memory_space<vmem>>, %arg3: memref<128x128xbf16, #tpu.memory_space<vmem>>) attributes {dimension_semantics = [#tpu.dimension_semantics<parallel>], iteration_bounds = array<i64: 2>, scalar_prefetch = 0 : i64, scratch_operands = 0 : i64, tpu.core_type = #tpu.core_type<tc>, window_params = [{transform_indices = @transform_0, window_bounds = array<i64: 128, 128>}, {pipeline_mode = #tpu.pipeline_mode<synchronous>, transform_indices = @transform_1, window_bounds = array<i64: 128, 128>}, {transform_indices = @transform_2, window_bounds = array<i64: 128, 128>}]} {
    %c0 = arith.constant 0 : index
    %c0_0 = arith.constant 0 : index
    %0 = vector.load %arg1[%c0, %c0_0] : memref<128x128xf32, #tpu.memory_space<vmem>>, vector<128x128xf32>
    %1 = arith.truncf %0 : vector<128x128xf32> to vector<128x128xbf16>
    %c0_1 = arith.constant 0 : index
    %c0_2 = arith.constant 0 : index
    %2 = vector.load %arg2[%c0_1, %c0_2] : memref<128x128xbf16, #tpu.memory_space<vmem>>, vector<128x128xbf16>
    %cst = arith.constant dense<0.000000e+00> : vector<128x128xf32>
    %3 = tpu.matmul %1, %2, %cst {dimension_numbers = #tpu.dot_dimension_numbers<[1], [0], [0], [1], [0, 0, 1, 1], [], []>} : vector<128x128xbf16>, vector<128x128xbf16>, vector<128x128xf32> -> vector<128x128xf32>
    %4 = arith.truncf %3 : vector<128x128xf32> to vector<128x128xbf16>
    %c0_3 = arith.constant 0 : index
    %c0_4 = arith.constant 0 : index
    %5 = vector.load %arg3[%c0_3, %c0_4] : memref<128x128xbf16, #tpu.memory_space<vmem>>, vector<128x128xbf16>
    tpu.vector_store %arg3[%c0_3, %c0_4], %4 {strides = array<i32>} : memref<128x128xbf16, #tpu.memory_space<vmem>>, vector<128x128xbf16>,
    return
  }
  func.func @transform_0(%arg0: i32) -> (i32, i32) {
    %c0_i32 = arith.constant 0 : i32
    %c0_i32_0 = arith.constant 0 : i32
    return %arg0, %c0_i32 : i32, i32
  }
  func.func @transform_1(%arg0: i32) -> (i32, i32) {
    %c0_i32 = arith.constant 0 : i32
    %c0_i32_0 = arith.constant 0 : i32
    %c0_i32_1 = arith.constant 0 : i32
    return %c0_i32, %c0_i32_0 : i32, i32
  }
  func.func @transform_2(%arg0: i32) -> (i32, i32) {
    %c0_i32 = arith.constant 0 : i32
    %c0_i32_0 = arith.constant 0 : i32
    return %arg0, %c0_i32 : i32, i32
  }
}

</mosaic_0001>

<bundles_post_ra>
// kernel: tpu_custom_call.1
= control target key start
LH: loop header
LB: loop body
LE: loop exit
PB: predicated region body
PF: predicated region fallthrough
CT: control target
= control target key end

     0   :  { %7 = vsyncpa [#allocation3], 0  ;;  %s956_s0 = inlined_call_operand.hbm [shape: f32[256,128], index: 0, kind: input, shape index: {}]   ;;  %s957_s1 = inlined_call_operand.hbm [shape: bf16[128,128], index: 1, kind: input, shape index: {}]   ;;  %s958_s2 = inlined_call_operand.hbm [shape: bf16[256,128], index: 2, kind: output, shape index: {}]  }
   0x1   :  { %9 = vsyncpa [#allocation3 + $0x1], 0 }
   0x2   :  { %10 = vsyncpa [#allocation6], 0 }
   0x3   :  { %11 = vsyncpa [#allocation4], 0 }
   0x4   :  { %13 = vsyncpa [#allocation4 + $0x1], 0  ;;  %s797_s9 = smov 0   ;;  %s799_s10 = smov 0  }
   0x5   :  { %s801_s11 = smov 0   ;;  %s803_s12 = smov 0  }
   0x6 LB: > { %s818_s13 = sadd.s32 4294967295, %s773_s12   ;;  %s451_s14 = sadd.s32 4294967294, %s773_s12   ;;  %s773_s12 = sphi %s803_s12, %s968_s12   ;;  %s769_s11 = sphi %s801_s11, %s967_s11   ;;  %s765_s10 = sphi %s799_s10, %s966_s10   ;;  %s761_s9 = sphi %s797_s9, %s965_s9  }
   0x7   : > { %p39_p0 = scmp.ne.s32.totalorder %s765_s10, %s761_s9  ;;  %p40_p1 = scmp.eq.s32.totalorder %s818_s13, 0 }
   0x8   : > { %p84_p2 = scmp.eq.s32.totalorder %s818_s13, 1  ;;  %p90_p3 = scmp.eq.s32.totalorder %s451_s14, 1 }
   0x9   : > { %p827_p4 = por %p40_p1, %p39_p0  ;;  %p452_p5 = scmp.ge.s32.totalorder %s773_s12, 1 }
   0xa   : > { %p832_p6 = por %p90_p3, %p39_p0  ;;  %p97_p7 = scmp.lt.s32.totalorder %s773_s12, 3 }
   0xb   : > { %s108_s19 = sshll.u32 %s957_s1, 4  ;;  %s775_s21 = smov [#allocation5]   ;;  %s109_s19 = int_to_ptr.hbm [resolvable:$true] %s108_s19 }
   0xc   : > { %p840_p8 = pnand %p452_p5, %p97_p7  ;;  %s110_s22 = sshll.u32 %s775_s21, 4  ;;  %s111_s22 = int_to_ptr.vmem [resolvable:$true] %s110_s22 }
   0xd   : > { %s850_s23 = sadd.s32 1, %s773_s12   ;;  %s776_s24 = smov 64  }
   0xe   : > { %p588_p9 = pneg %p840_p8  ;;  %s777_s25 = smov 4  }
   0xf   : > { %s23_s26 = ssub.s32 %s773_s12, %s850_s23  ;;  %s26_s27 = sadd.s32 1, %s769_s11 }
  0x10   : > { %p589_p10 = pnand %p588_p9, %p40_p1  ;;  %p24_p12 = scmp.eq.s32.totalorder %s23_s26, 0 }
  0x11   : > { %p33_p13 = scmp.ne.s32.totalorder %s769_s11, %s765_s10  ;;  %p34_p0 = scmp.eq.s32.totalorder %s773_s12, 0 }
  0x12   : > { %591 = dma.hbm_to_vmem [thread:$0]  (!%p589_p10), %s109_s19, 1024, %s111_s22, [#allocation6], %s776_s24, %s776_s24, %s777_s25  }
  0x13   : > { %p601_p3 = scmp.lt.s32.totalorder %s773_s12, 2  ;;  %p35_p5 = por %p34_p0, %p33_p13 }
  0x14   : > { %s860_s28 = scalar_select %p24_p12, %s769_s11, %s26_s27  }
  0x15   : > { %p864_p7 = por %p84_p2, %p33_p13  ;;  %s124_s30 = sand.u32 1, %s769_s11  }
  0x16   : > { %s499_s3 = sshll.u32 %s773_s12, 7  ;;  %s455_s4 = sshll.u32 %s124_s30, 7 }
  0x17   : > { %s133_s7 = scalar_lea.hbm %s956_s0, %s499_s3  ;;  %s128_s14 = scalar_lea.vmem [#allocation2], %s455_s4 }
  0x18   : > { %s134_s8 = sshll.u32 %s133_s7, 4  ;;  %s136_s17 = sshll.u32 %s128_s14, 4  ;;  %s135_s8 = int_to_ptr.hbm [resolvable:$true] %s134_s8  ;;  %s137_s17 = int_to_ptr.vmem [resolvable:$true] %s136_s17 }
  0x19   : > { %p875_p9 = pnand %p601_p3, %p35_p5  ;;  %s125_s19 = scalar_lea.sflag [#allocation3], %s124_s30 }
  0x1a   : > { %s673_s21 = sshra.s32 %s135_s8, 4  ;;  %s680_s26 = scalar_lea.hbm %s956_s0, 256  ;;  %s674_s21 = int_to_ptr.hbm [resolvable:$true] %s673_s21 }
  0x1b   : > { %s675_s22 = scalar_lea.hbm %s674_s21, 128  ;;  %p677_p10 = pneg %p875_p9 }
  0x1c   : > { %p676_p2 = scmp.ne.s32.totalorder %s674_s21, %s675_s22  ;;  %p681_p0 = scmp.lt.s32.totalorder %s674_s21, %s956_s0 }
  0x1d   : > { %p682_p3 = scmp.lt.s32.totalorder %s680_s26, %s675_s22 }
  0x1e   : > { %p678_p12 = pnand %p677_p10, %p676_p2 }
  0x1f   : > { %p683_p5 = por %p682_p3, %p681_p0 }
  0x20   : > { %p679_p13 = pneg %p678_p12 }
  0x22   : > { %p684_p11 = pnand %p683_p5, %p679_p13 }
  0x24   : > { %687 = shalt.err (!%p684_p11)
}
  0x25   : > { %s778_s30 = smov 128   ;;  %s779_s4 = smov 8  }
  0x26   : > { %595 = dma.hbm_to_vmem [thread:$0]  (!%p875_p9), %s135_s8, 2048, %s137_s17, %s125_s19, %s778_s30, %s778_s30, %s779_s4  }
  0x27   : > { %148 = sbr.rel (%p840_p8) target bundleno = 243 (0xf3), region = 28  ;;  %s892_s5 = sand.u32 (!%p840_p8), 1, %s765_s10  }
  0x28   : > { %s459_s6 = sshll.u32 (!%p840_p8), %s892_s5, 7  ;;  %s151_s7 = scalar_lea.sflag (!%p840_p8), [#allocation3], %s892_s5 }
  0x29   : > { %s896_s14 = scalar_lea.vmem (!%p840_p8), [#allocation2], %s459_s6 }
  0x2c   : > { %748 = dma.done.wait (%p827_p4), %s151_s7, 2048  }
  0x2d   : > { %750 = vsyncadd (%p827_p4), %s151_s7, 4294965248 }
  0x2e   : > { %752 = dma.done.wait (%p40_p1), [#allocation6], 1024  }
  0x2f   : > { %754 = vsyncadd (%p40_p1), [#allocation6], 4294966272  ;;  %v507_v0 = vld [vmem:[#allocation5 + $0x38] sm:$0xff]  ;;  %v506_v1 = vld [vmem:[#allocation5 + $0x30] sm:$0xff]  ;;  %s461_s15 = sshll.u32 %s892_s5, 6  ;;  %s508_s8 = sshll.u32 %s818_s13, 6 }
  0x30   : > { %271 = vmatpush.bf16.msra.mxu0 %v507_v0  ;;  %556 = vmatpush.bf16.msra.mxu1 %v507_v0  ;;  %v505_v2 = vld [vmem:[#allocation5 + $0x28] sm:$0xff]  ;;  %v504_v3 = vld [vmem:[#allocation5 + $0x20] sm:$0xff]  ;;  %v503_v4 = vld [vmem:[#allocation5 + $0x18] sm:$0xff]  ;;  %s180_s20 = scalar_lea.vmem [#allocation7], %s461_s15  ;;  %s364_s19 = scalar_lea.hbm %s958_s2, %s508_s8 }
  0x31   : > { %557 = vmatpush.bf16.msra.mxu2 %v507_v0  ;;  %558 = vmatpush.bf16.msra.mxu3 %v507_v0  ;;  %v502_v5 = vld [vmem:[#allocation5 + $0x10] sm:$0xff]  ;;  %v501_v6 = vld [vmem:[#allocation5 + $0x8] sm:$0xff]  ;;  %v500_v7 = vld [vmem:[#allocation5] sm:$0xff]  ;;  %s365_s21 = sshll.u32 %s180_s20, 4  ;;  %s367_s22 = sshll.u32 %s364_s19, 4  ;;  %s366_s21 = int_to_ptr.vmem [resolvable:$true] %s365_s21  ;;  %s368_s22 = int_to_ptr.hbm [resolvable:$true] %s367_s22 }
  0x32   : > { %v183_v8 = vld [vmem:[%s896_s14] sm:$0xff]  ;;  %v184_v9 = vld [vmem:[%s896_s14 + $0x8] sm:$0xff]  ;;  %v185_v20 = vld [vmem:[%s896_s14 + $0x10] sm:$0xff]  ;;  %s353_s13 = scalar_lea.sflag [#allocation4], %s892_s5  ;;  %s717_s24 = sshra.s32 %s368_s22, 4  ;;  %s718_s24 = int_to_ptr.hbm [resolvable:$true] %s717_s24 }
  0x33   : > { %v187_v10 = vld [vmem:[%s896_s14 + $0x20] sm:$0xff]  ;;  %v188_v11 = vld [vmem:[%s896_s14 + $0x28] sm:$0xff]  ;;  %v199_v16 = vpack.c.bf16 %v184_v9, %v183_v8  ;;  %v186_v21 = vld [vmem:[%s896_s14 + $0x18] sm:$0xff]  ;;  %s719_s25 = scalar_lea.hbm %s718_s24, 64  ;;  %s723_s3 = scalar_lea.hbm %s958_s2, 128 }
  0x34   : > { %272 = vmatpush.bf16.msra.mxu0 %v506_v1  ;;  %559 = vmatpush.bf16.msra.mxu1 %v506_v1  ;;  %v191_v12 = vld [vmem:[%s896_s14 + $0x40] sm:$0xff]  ;;  %v192_v13 = vld [vmem:[%s896_s14 + $0x48] sm:$0xff]  ;;  %v201_v17 = vpack.c.bf16 %v188_v11, %v187_v10  ;;  %v189_v22 = vld [vmem:[%s896_s14 + $0x30] sm:$0xff]  ;;  %v200_v28 = vpack.c.bf16 %v186_v21, %v185_v20  ;;  %p720_p1 = scmp.ne.s32.totalorder %s718_s24, %s719_s25  ;;  %p724_p11 = scmp.lt.s32.totalorder %s718_s24, %s958_s2 }
  0x35   : > { %560 = vmatpush.bf16.msra.mxu2 %v506_v1  ;;  %561 = vmatpush.bf16.msra.mxu3 %v506_v1  ;;  %v195_v14 = vld [vmem:[%s896_s14 + $0x60] sm:$0xff]  ;;  %v196_v15 = vld [vmem:[%s896_s14 + $0x68] sm:$0xff]  ;;  %v203_v18 = vpack.c.bf16 %v192_v13, %v191_v12  ;;  %v190_v23 = vld [vmem:[%s896_s14 + $0x38] sm:$0xff]  ;;  %p725_p9 = scmp.lt.s32.totalorder %s723_s3, %s719_s25 }
  0x36   : > { %v205_v19 = vpack.c.bf16 %v196_v15, %v195_v14  ;;  %v193_v24 = vld [vmem:[%s896_s14 + $0x50] sm:$0xff]  ;;  %v194_v25 = vld [vmem:[%s896_s14 + $0x58] sm:$0xff]  ;;  %v202_v29 = vpack.c.bf16 %v190_v23, %v189_v22  ;;  %p721_p4 = pnand %p720_p1, %p864_p7 }
  0x37   : > { %v197_v26 = vld [vmem:[%s896_s14 + $0x70] sm:$0xff]  ;;  %v198_v27 = vld [vmem:[%s896_s14 + $0x78] sm:$0xff]  ;;  %v204_v30 = vpack.c.bf16 %v194_v25, %v193_v24  ;;  %p726_p2 = por %p725_p9, %p724_p11 }
  0x38   : > { %273 = vmatpush.bf16.msra.mxu0 %v505_v2  ;;  %562 = vmatpush.bf16.msra.mxu1 %v505_v2  ;;  %v206_v31 = vpack.c.bf16 %v198_v27, %v197_v26  ;;  %p722_p8 = pneg %p721_p4 }
  0x39   : > { %563 = vmatpush.bf16.msra.mxu2 %v505_v2  ;;  %564 = vmatpush.bf16.msra.mxu3 %v505_v2 }
  0x3a   : > { %p727_p10 = pnand %p726_p2, %p722_p8 }
  0x3c   : > { %274 = vmatpush.bf16.msra.mxu0 %v504_v3  ;;  %565 = vmatpush.bf16.msra.mxu1 %v504_v3 }
  0x3d   : > { %566 = vmatpush.bf16.msra.mxu2 %v504_v3  ;;  %567 = vmatpush.bf16.msra.mxu3 %v504_v3 }
  0x40   : > { %275 = vmatpush.bf16.msra.mxu0 %v503_v4  ;;  %568 = vmatpush.bf16.msra.mxu1 %v503_v4 }
  0x41   : > { %569 = vmatpush.bf16.msra.mxu2 %v503_v4  ;;  %570 = vmatpush.bf16.msra.mxu3 %v503_v4 }
  0x44   : > { %276 = vmatpush.bf16.msra.mxu0 %v502_v5  ;;  %571 = vmatpush.bf16.msra.mxu1 %v502_v5 }
  0x45   : > { %572 = vmatpush.bf16.msra.mxu2 %v502_v5  ;;  %573 = vmatpush.bf16.msra.mxu3 %v502_v5 }
  0x48   : > { %277 = vmatpush.bf16.msra.mxu0 %v501_v6  ;;  %574 = vmatpush.bf16.msra.mxu1 %v501_v6 }
  0x49   : > { %575 = vmatpush.bf16.msra.mxu2 %v501_v6  ;;  %576 = vmatpush.bf16.msra.mxu3 %v501_v6 }
  0x4c   : > { %278 = vmatpush.bf16.msra.mxu0 %v500_v7  ;;  %577 = vmatpush.bf16.msra.mxu1 %v500_v7 }
  0x4d   : > { %578 = vmatpush.bf16.msra.mxu2 %v500_v7  ;;  %579 = vmatpush.bf16.msra.mxu3 %v500_v7 }
  0x4f   : > { %279 = vmatmul.bf16.vlgmr.msra.gmra.mxu0 %v199_v16  ;;  %289 = vmatmul.bf16.vlgmr.msra.gmra.mxu1 %v201_v17 }
  0x50   : > { %299 = vmatmul.bf16.vlgmr.msra.gmra.mxu2 %v203_v18  ;;  %309 = vmatmul.bf16.vlgmr.msra.gmra.mxu3 %v205_v19 }
  0x5f   : > { %284 = vmatmul.bf16.gmra.mxu0 %v200_v28  ;;  %294 = vmatmul.bf16.gmra.mxu1 %v202_v29 }
  0x60   : > { %304 = vmatmul.bf16.gmra.mxu2 %v204_v30  ;;  %314 = vmatmul.bf16.gmra.mxu3 %v206_v31 }
  0xcc   : > { %v280_v32 = vpop.f32.mrf.mxu0  ;;  %v290_v33 = vpop.f32.mrf.mxu1 }
  0xd3   : > { %v300_v34 = vpop.f32.mrf.mxu2  ;;  %v310_v35 = vpop.f32.mrf.mxu3 }
  0xd4   : > { %v282_v36 = vpop.f32.mrf.mxu0  ;;  %v292_v37 = vpop.f32.mrf.mxu1 }
  0xd5   : > { %v512_v38 = vpack.c.bf16 %v282_v36, %v280_v32  ;;  %v522_v39 = vpack.c.bf16 %v292_v37, %v290_v33 }
  0xd7   : > { %513 = vst [vmem:[%s180_s20] sm:$0xff] %v512_v38  }
  0xd8   : > { %550 = vst [vmem:[%s180_s20 + $0x10] sm:$0xff] %v522_v39  }
  0xdb   : > { %v302_v40 = vpop.f32.mrf.mxu2  ;;  %v312_v41 = vpop.f32.mrf.mxu3 }
  0xdc   : > { %v532_v42 = vpack.c.bf16 %v302_v40, %v300_v34  ;;  %v542_v43 = vpack.c.bf16 %v312_v41, %v310_v35  ;;  %v285_v44 = vpop.f32.mrf.mxu0  ;;  %v295_v45 = vpop.f32.mrf.mxu1 }
  0xde   : > { %552 = vst [vmem:[%s180_s20 + $0x20] sm:$0xff] %v532_v42  }
  0xdf   : > { %554 = vst [vmem:[%s180_s20 + $0x30] sm:$0xff] %v542_v43  }
  0xe3   : > { %v305_v46 = vpop.f32.mrf.mxu2  ;;  %v315_v47 = vpop.f32.mrf.mxu3 }
  0xe4   : > { %v287_v48 = vpop.f32.mrf.mxu0  ;;  %v297_v49 = vpop.f32.mrf.mxu1 }
  0xe5   : > { %v517_v50 = vpack.c.bf16 %v287_v48, %v285_v44  ;;  %v527_v51 = vpack.c.bf16 %v297_v49, %v295_v45 }
  0xe7   : > { %549 = vst [vmem:[%s180_s20 + $0x8] sm:$0xff] %v517_v50  }
  0xe8   : > { %551 = vst [vmem:[%s180_s20 + $0x18] sm:$0xff] %v527_v51  }
  0xeb   : > { %v307_v52 = vpop.f32.mrf.mxu2  ;;  %v317_v53 = vpop.f32.mrf.mxu3 }
  0xec   : > { %v537_v54 = vpack.c.bf16 %v307_v52, %v305_v46  ;;  %v547_v55 = vpack.c.bf16 %v317_v53, %v315_v47 }
  0xee   : > { %553 = vst [vmem:[%s180_s20 + $0x28] sm:$0xff] %v537_v54  }
  0xef   : > { %555 = vst [vmem:[%s180_s20 + $0x38] sm:$0xff] %v547_v55  }
  0xf0   : > { %730 = shalt.err (!%p727_p10)
}
  0xf1   : > { %s780_s5 = smov 64   ;;  %s781_s6 = smov 4  }
  0xf2   : > { %586 = dma.vmem_to_hbm [thread:$0]  (%p864_p7), %s366_s21, 1024, %s368_s22, %s353_s13, %s780_s5, %s780_s5, %s781_s6  }
  0xf3 PF: > { %s382_s7 = sand.u32 1, %s761_s9   ;;  %p964_p12 = scmp.ge.s32.totalorder %s773_s12, 2 }
  0xf4   : > { %s383_s14 = scalar_lea.sflag [#allocation4], %s382_s7 }
  0xf5   : > { %p597_p13 = pnand %p964_p12, %p832_p6 }
  0xf7   : > { %p598_p0 = pneg %p597_p13 }
  0xf9   : > { %756 = dma.done.wait (%p598_p0), %s383_s14, 1024  }
  0xfa   : > { %758 = vsyncadd (%p598_p0), %s383_s14, 4294966272  ;;  %p16_p3 = scmp.ge.s32.totalorder %s850_s23, 4   ;;  %s965_s9 = smov %s765_s10 }
  0xfb   : > { %s966_s10 = smov %s769_s11  ;;  %s967_s11 = smov %s860_s28 }
  0xfc   : > { %s968_s12 = smov %s850_s23  ;;  %18 = sbr.rel (!%p16_p3) target bundleno = 6 (0x6), region = 77 }
 0x101   :  { %389 = vsyncpa [#allocation3], 1 }
 0x102   :  { %391 = vsyncpa [#allocation3 + $0x1], 1 }
 0x103   :  { %392 = vsyncpa [#allocation6], 1 }
 0x104   :  { %393 = vsyncpa [#allocation4], 1 }
 0x105   :  { %395 = vsyncpa [#allocation4 + $0x1], 1 }

</bundles_post_ra>
